<compile_context>
chip_gen: v6e
topology: v6e:2x2x1
jax: 0.10.0
libtpu: 0.0.40
codegen_flags: <defaults>
</compile_context>

<pallas_src>
from typing import Callable

import jax
import jax.numpy as jnp
from jax.experimental import pallas as pl
from jax.experimental.pallas import tpu as pltpu


_LANES = 128
_MAX_TILE_ROWS = 2048                   # 2048 x 128 f32 = 1 MiB per input tile
_VMEM_LIMIT_BYTES = 32 * 1024 * 1024    # fits v5e/v6e (128 MiB) and v7x (64 MiB)


def _round_up(x: int, m: int) -> int:
    return ((x + m - 1) // m) * m


# ---------------------------------------------------------------------------
# Pallas kernel: accumulating sum of squared differences over large row tiles.
# Grid = (num_cores ["parallel"], blocks_per_core ["arbitrary"]).
# ---------------------------------------------------------------------------
def _make_sse_kernel(blocks_per_core: int, tile_rows: int, n_valid: int):
    """Build the SSE reduction kernel with static tiling params baked in."""

    def kernel(x_ref, t_ref, out_ref, acc_ref):
        c = pl.program_id(0)          # TensorCore ("parallel") axis
        i = pl.program_id(1)          # reduction ("arbitrary") axis

        @pl.when(i == 0)
        def _():
            acc_ref[...] = jnp.zeros_like(acc_ref)

        # Global element index of every lane in this tile; masks the ragged
        # tail and any fully out-of-range block that the index_map clamped
        # back onto valid data.
        logical_block = c * blocks_per_core + i
        row_start = logical_block * tile_rows
        row_ids = jax.lax.broadcasted_iota(jnp.int32, (tile_rows, _LANES), 0)
        lane_ids = jax.lax.broadcasted_iota(jnp.int32, (tile_rows, _LANES), 1)
        elem_idx = (row_start + row_ids) * _LANES + lane_ids
        valid = elem_idx < n_valid

        # Cast to f32 inside the kernel (keeps HBM traffic at native width).
        d = x_ref[...].astype(jnp.float32) - t_ref[...].astype(jnp.float32)
        d = jnp.where(valid, d, 0.0)
        acc_ref[...] += d * d          # pure VPU; no per-step cross-lane reduce

        @pl.when(i == pl.num_programs(1) - 1)
        def _():
            # One sublane reduce per core; lane-dense (1, 128) partial output.
            out_ref[0] = jnp.sum(acc_ref[...], axis=0, keepdims=True)

    return kernel


def _pallas_sse(x: jax.Array, target: jax.Array) -> jax.Array:
    """Sum of squared error between x and target (any shape), via Pallas."""
    assert x.shape == target.shape, "prediction/target shape mismatch"
    n = x.size

    # Sublane packing of the narrower input dtype: f32 -> 8, bf16 -> 16, i8 -> 32.
    itemsize = min(jnp.dtype(x.dtype).itemsize, jnp.dtype(target.dtype).itemsize)
    sublane = 8 * max(1, 4 // max(1, itemsize))
    chunk = sublane * _LANES

    xf = x.reshape(-1)
    tf = target.reshape(-1)
    n_pad = _round_up(n, chunk)
    if n_pad != n:
        # TODO(synk): tail pad materializes one extra copy; it is skipped
        # entirely when n is already a multiple of sublane*128 (common case).
        xf = jnp.pad(xf, (0, n_pad - n))
        tf = jnp.pad(tf, (0, n_pad - n))
    x2d = xf.reshape(-1, _LANES)
    t2d = tf.reshape(-1, _LANES)

    rows = n_pad // _LANES
    num_cores = 2 if rows >= 2 * sublane else 1   # v7x: 2 TCs; harmless on v5e/v6e
    rows_per_core = -(-rows // num_cores)
    tile_rows = max(sublane, min(_MAX_TILE_ROWS, _round_up(rows_per_core, sublane)))
    total_blocks = -(-rows // tile_rows)
    blocks_per_core = -(-total_blocks // num_cores)
    max_block = total_blocks - 1

    def in_index_map(c, i, _bpc=blocks_per_core, _mb=max_block):
        # Clamp fully out-of-range logical blocks onto the last valid block;
        # the kernel's element mask zeroes their contribution.
        return (jnp.minimum(c * _bpc + i, _mb), 0)

    kernel = _make_sse_kernel(blocks_per_core, tile_rows, n)

    partials = pl.pallas_call(
        kernel,
        out_shape=jax.ShapeDtypeStruct((num_cores, 1, _LANES), jnp.float32),
        grid_spec=pltpu.PrefetchScalarGridSpec(
            num_scalar_prefetch=0,
            grid=(num_cores, blocks_per_core),
            in_specs=[
                pl.BlockSpec((tile_rows, _LANES), in_index_map),
                pl.BlockSpec((tile_rows, _LANES), in_index_map),
            ],
            out_specs=pl.BlockSpec((1, 1, _LANES), lambda c, i: (c, 0, 0)),
            scratch_shapes=[pltpu.VMEM((tile_rows, _LANES), jnp.float32)],
        ),
        compiler_params=pltpu.CompilerParams(
            dimension_semantics=("parallel", "arbitrary"),
            vmem_limit_bytes=_VMEM_LIMIT_BYTES,
        ),
    )(x2d, t2d)

    # Tiny final reduction of per-core (1, 128) partials.
    return jnp.sum(partials, dtype=jnp.float32)


# ---------------------------------------------------------------------------
# CyberModule port: same train/eval dispatch semantics as the torch ABC.
# ---------------------------------------------------------------------------
class CyberModuleJax:
    """JAX/Pallas analogue of CyberModule.

    forward() dispatches to compute_training_loss in train mode and to
    forward_method in eval mode, exactly mirroring the reference class.
    """

    _forward: Callable

    def __init__(self):
        # CyberModule has no parameters of its own (abstract base).
        self._forward = self.compute_training_loss
        self.training = True

    def forward(self, *args, **kwargs):
        return self._forward(*args, **kwargs)

    __call__ = forward

    def train(self, mode: bool = True) -> "CyberModuleJax":
        # Matches reference: it always calls torch.nn.Module.train(self) (mode=True).
        self.training = True
        if mode:
            self._forward = self.compute_training_loss
        else:
            self._forward = self.forward_method
        return self

    def forward_method(self, *args, **kwargs):
        # TODO(synk): abstract in the reference; no eval-mode compute is defined.
        # (Typo "forword_method" intentionally matches the reference message.)
        raise NotImplementedError(
            f'Module [{type(self).__name__}] is missing the required "forword_method" function'
        )

    def compute_training_loss(self, x: jax.Array, target: jax.Array) -> jax.Array:
        """Default training loss: MSE(x, target), reduction in a Pallas kernel."""
        n = x.size
        sse = _pallas_sse(x, target)
        return sse / jnp.float32(n)

    def get_train_collator(self) -> Callable:
        """Default collator: stack a list of (x, target) pairs along batch axis 0."""
        def collate(batch):
            xs, ts = zip(*batch)
            return jnp.stack(xs, axis=0), jnp.stack(ts, axis=0)
        return collate


# ---------------------------------------------------------------------------
# Demo / self-test
# ---------------------------------------------------------------------------
if __name__ == "__main__":
    key = jax.random.PRNGKey(0)
    kx, kt = jax.random.split(key)

    # Small NCHW inputs consistent with a typical vision CyberModule subclass.
    x = jax.random.normal(kx, (2, 4, 16, 16), dtype=jnp.float32)
    target = jax.random.normal(kt, (2, 4, 16, 16), dtype=jnp.float32)

    mod = CyberModuleJax().train(True)
    loss = mod(x, target)
    loss = jax.block_until_ready(loss)

    # Correctness check against plain-JAX reference (MSE).
    ref = jnp.mean((x - target) ** 2)
    assert jnp.allclose(loss, ref, rtol=1e-5, atol=1e-6), (loss, ref)

    print("KERNEL_OK")
</pallas_src>

<mosaic_0001>
module attributes {stable_mosaic.version = 11 : i64} {
  func.func @kernel(%arg0: i32, %arg1: i32, %arg2: memref<8x128xf32, #tpu.memory_space<vmem>>, %arg3: memref<8x128xf32, #tpu.memory_space<vmem>>, %arg4: memref<1x1x128xf32, #tpu.memory_space<vmem>>, %arg5: memref<8x128xf32, #tpu.memory_space<vmem>>) attributes {dimension_semantics = [#tpu.dimension_semantics<parallel>, #tpu.dimension_semantics<arbitrary>], iteration_bounds = array<i64: 2, 1>, scalar_prefetch = 0 : i64, scratch_operands = 1 : i64, tpu.core_type = #tpu.core_type<tc>, window_params = [{transform_indices = @transform_0, window_bounds = array<i64: 8, 128>}, {transform_indices = @transform_1, window_bounds = array<i64: 8, 128>}, {transform_indices = @transform_2, window_bounds = array<i64: 1, 1, 128>}]} {
    %c0_i32 = arith.constant 0 : i32
    %0 = arith.cmpi eq, %arg1, %c0_i32 : i32
    %1 = arith.extui %0 : i1 to i32
    %c0_i32_0 = arith.constant 0 : i32
    %2 = arith.cmpi ne, %1, %c0_i32_0 : i32
    scf.if %2 {
      %cst_10 = arith.constant 0.000000e+00 : f32
      %27 = vector.broadcast %cst_10 : f32 to vector<8x128xf32>
      %c0_11 = arith.constant 0 : index
      %c0_12 = arith.constant 0 : index
      %28 = vector.load %arg5[%c0_11, %c0_12] : memref<8x128xf32, #tpu.memory_space<vmem>>, vector<8x128xf32>
      tpu.vector_store %arg5[%c0_11, %c0_12], %27 {strides = array<i32>} : memref<8x128xf32, #tpu.memory_space<vmem>>, vector<8x128xf32>,
    } else {
    }
    %c1_i32 = arith.constant 1 : i32
    %3 = arith.muli %arg0, %c1_i32 : i32
    %4 = arith.addi %3, %arg1 : i32
    %c8_i32 = arith.constant 8 : i32
    %5 = arith.muli %4, %c8_i32 : i32
    %6 = tpu.iota {dimensions = array<i32: 0>} : vector<8x128xi32>
    %7 = tpu.iota {dimensions = array<i32: 1>} : vector<8x128xi32>
    %8 = vector.broadcast %5 : i32 to vector<8x128xi32>
    %9 = arith.addi %8, %6 : vector<8x128xi32>
    %c128_i32 = arith.constant 128 : i32
    %10 = vector.broadcast %c128_i32 : i32 to vector<8x128xi32>
    %11 = arith.muli %9, %10 : vector<8x128xi32>
    %12 = arith.addi %11, %7 : vector<8x128xi32>
    %c2048_i32 = arith.constant 2048 : i32
    %13 = vector.broadcast %c2048_i32 : i32 to vector<8x128xi32>
    %14 = arith.cmpi slt, %12, %13 : vector<8x128xi32>
    %c0 = arith.constant 0 : index
    %c0_1 = arith.constant 0 : index
    %15 = vector.load %arg2[%c0, %c0_1] : memref<8x128xf32, #tpu.memory_space<vmem>>, vector<8x128xf32>
    %c0_2 = arith.constant 0 : index
    %c0_3 = arith.constant 0 : index
    %16 = vector.load %arg3[%c0_2, %c0_3] : memref<8x128xf32, #tpu.memory_space<vmem>>, vector<8x128xf32>
    %17 = arith.subf %15, %16 : vector<8x128xf32>
    %cst = arith.constant 0.000000e+00 : f32
    %18 = vector.broadcast %cst : f32 to vector<8x128xf32>
    %19 = arith.select %14, %17, %18 : vector<8x128xi1>, vector<8x128xf32>
    %c0_4 = arith.constant 0 : index
    %c0_5 = arith.constant 0 : index
    %20 = vector.load %arg5[%c0_4, %c0_5] : memref<8x128xf32, #tpu.memory_space<vmem>>, vector<8x128xf32>
    %21 = arith.mulf %19, %19 : vector<8x128xf32>
    %22 = arith.addf %20, %21 : vector<8x128xf32>
    %c0_6 = arith.constant 0 : index
    %c0_7 = arith.constant 0 : index
    %23 = vector.load %arg5[%c0_6, %c0_7] : memref<8x128xf32, #tpu.memory_space<vmem>>, vector<8x128xf32>
    tpu.vector_store %arg5[%c0_6, %c0_7], %22 {strides = array<i32>} : memref<8x128xf32, #tpu.memory_space<vmem>>, vector<8x128xf32>,
    %c0_i32_8 = arith.constant 0 : i32
    %24 = arith.cmpi eq, %arg1, %c0_i32_8 : i32
    %25 = arith.extui %24 : i1 to i32
    %c0_i32_9 = arith.constant 0 : i32
    %26 = arith.cmpi ne, %25, %c0_i32_9 : i32
    scf.if %26 {
      %c0_10 = arith.constant 0 : index
      %c0_11 = arith.constant 0 : index
      %27 = vector.load %arg5[%c0_10, %c0_11] : memref<8x128xf32, #tpu.memory_space<vmem>>, vector<8x128xf32>
      %cst_12 = arith.constant dense<0.000000e+00> : vector<128xf32>
      %28 = vector.multi_reduction <add>, %27, %cst_12 [0] : vector<8x128xf32> to vector<128xf32>
      %29 = vector.shape_cast %28 : vector<128xf32> to vector<1x128xf32>
      %c0_13 = arith.constant 0 : index
      %c0_14 = arith.constant 0 : index
      %c0_15 = arith.constant 0 : index
      %30 = vector.load %arg4[%c0_13, %c0_14, %c0_15] : memref<1x1x128xf32, #tpu.memory_space<vmem>>, vector<1x1x128xf32>
      %31 = vector.shape_cast %30 : vector<1x1x128xf32> to vector<1x128xf32>
      %32 = vector.shape_cast %29 : vector<1x128xf32> to vector<1x1x128xf32>
      tpu.vector_store %arg4[%c0_13, %c0_14, %c0_15], %32 {strides = array<i32>} : memref<1x1x128xf32, #tpu.memory_space<vmem>>, vector<1x1x128xf32>,
    } else {
    }
    return
  }
  func.func @transform_0(%arg0: i32, %arg1: i32) -> (i32, i32) {
    %c1_i32 = arith.constant 1 : i32
    %0 = arith.muli %arg0, %c1_i32 : i32
    %1 = arith.addi %0, %arg1 : i32
    %c1_i32_0 = arith.constant 1 : i32
    %2 = arith.minsi %1, %c1_i32_0 : i32
    %c0_i32 = arith.constant 0 : i32
    %c0_i32_1 = arith.constant 0 : i32
    return %2, %c0_i32 : i32, i32
  }
  func.func @transform_1(%arg0: i32, %arg1: i32) -> (i32, i32) {
    %c1_i32 = arith.constant 1 : i32
    %0 = arith.muli %arg0, %c1_i32 : i32
    %1 = arith.addi %0, %arg1 : i32
    %c1_i32_0 = arith.constant 1 : i32
    %2 = arith.minsi %1, %c1_i32_0 : i32
    %c0_i32 = arith.constant 0 : i32
    %c0_i32_1 = arith.constant 0 : i32
    return %2, %c0_i32 : i32, i32
  }
  func.func @transform_2(%arg0: i32, %arg1: i32) -> (i32, i32, i32) {
    %c0_i32 = arith.constant 0 : i32
    %c0_i32_0 = arith.constant 0 : i32
    %c0_i32_1 = arith.constant 0 : i32
    return %arg0, %c0_i32, %c0_i32_0 : i32, i32, i32
  }
}

</mosaic_0001>

<bundles_post_ra>
// kernel: tpu_custom_call.1
= control target key start
LH: loop header
LB: loop body
LE: loop exit
PB: predicated region body
PF: predicated region fallthrough
CT: control target
= control target key end

     0   :  { %s859_s0 = inlined_call_operand.hbm [shape: f32[16,128], index: 0, kind: input, shape index: {}]   ;;  %s860_s1 = inlined_call_operand.hbm [shape: f32[16,128], index: 1, kind: input, shape index: {}]   ;;  %s861_s2 = inlined_call_operand.hbm [shape: f32[2,1,128], index: 2, kind: output, shape index: {}]  }
   0x1   :  { %862 = sst [smem:[#allocation12_spill]] %s859_s0 }
   0x2   :  { %7 = vsyncpa [#allocation4], 0 }
   0x3   :  { %9 = vsyncpa [#allocation4 + $0x1], 0 }
   0x4   :  { %10 = vsyncpa [#allocation7], 0 }
   0x5   :  { %12 = vsyncpa [#allocation7 + $0x1], 0 }
   0x6   :  { %13 = vsyncpa [#allocation5], 0 }
   0x7   :  { %15 = vsyncpa [#allocation5 + $0x1], 0  ;;  %s666_s9 = smov 0   ;;  %s668_s10 = smov 0  }
   0x8   :  { %s670_s11 = smov 0   ;;  %s672_s12 = smov 0  }
   0x9   :  { %s674_s13 = smov 0   ;;  %s676_s14 = smov 0  }
   0xa   :  { %s678_s15 = smov 0   ;;  %s680_s16 = smov 0  }
   0xb   :  { %s682_s17 = smov 0  }
   0xc LB: > { %s376_s18 = sadd.s32 4294967295, %s646_s17   ;;  %s377_s19 = sadd.s32 4294967294, %s646_s17   ;;  %s646_s17 = sphi %s682_s17, %s21_s17   ;;  %s642_s16 = sphi %s680_s16, %s878_s16   ;;  %s638_s15 = sphi %s678_s15, %s877_s15   ;;  %s634_s14 = sphi %s676_s14, %s876_s14   ;;  %s630_s13 = sphi %s674_s13, %s875_s13   ;;  %s626_s12 = sphi %s672_s12, %s874_s12   ;;  %s622_s11 = sphi %s670_s11, %s873_s11   ;;  %s618_s10 = sphi %s668_s10, %s872_s10   ;;  %s614_s9 = sphi %s666_s9, %s871_s9  }
   0xd   : > { %s33_s20 = sadd.s32 1, %s642_s16  ;;  %p38_p0 = scmp.lt.s32.totalorder %s642_s16, 1 }
   0xe   : > { %p35_p1 = scmp.ge.s32.totalorder %s33_s20, 2  ;;  %s46_s21 = sadd.s32 1, %s634_s14 }
   0xf   : > { %s715_s22 = scalar_select %p38_p0, %s642_s16, 1 }
  0x10   : > { %s880_s20 = smov (%p35_p1, %s33_s20), 0  ;;  %p53_p2 = scmp.ne.s32.totalorder %s634_s14, %s630_s13 }
  0x11   : > { %p54_p3 = scmp.eq.s32.totalorder %s646_s17, 0  ;;  %p41_p4 = scmp.lt.s32.totalorder %s880_s20, 1 }
  0x12   : > { %p59_p5 = scmp.ne.s32.totalorder %s630_s13, %s626_s12  ;;  %p60_p7 = scmp.eq.s32.totalorder %s376_s18, 0 }
  0x13   : > { %p724_p6 = por %p54_p3, %p53_p2  ;;  %s101_s26 = ssub.s32 %s642_s16, %s880_s20 }
  0x14   : > { %s42_s24 = scalar_select %p41_p4, %s880_s20, 1 }
  0x15   : > { %p729_p8 = por %p60_p7, %p59_p5  ;;  %p102_p9 = scmp.eq.s32.totalorder %s101_s26, 0 }
  0x16   : > { %s43_s27 = ssub.s32 %s715_s22, %s42_s24  ;;  %s104_s28 = sadd.s32 1, %s622_s11 }
  0x17   : > { %p44_p10 = scmp.eq.s32.totalorder %s43_s27, 0  ;;  %p114_p11 = scmp.ne.s32.totalorder %s622_s11, %s618_s10 }
  0x18   : > { %s738_s29 = scalar_select %p102_p9, %s622_s11, %s104_s28  }
  0x19   : > { %s741_s30 = scalar_select %p44_p10, %s634_s14, %s46_s21  }
  0x1a   : > { %p115_p12 = scmp.eq.s32.totalorder %s376_s18, 1  ;;  %p120_p13 = scmp.ne.s32.totalorder %s618_s10, %s614_s9 }
  0x1b   : > { %p121_p0 = scmp.eq.s32.totalorder %s377_s19, 1  ;;  %p408_p4 = scmp.lt.s32.totalorder %s646_s17, 2 }
  0x1c   : > { %p747_p1 = por %p115_p12, %p114_p11  ;;  %s758_s5 = sand.u32 1, %s634_s14  }
  0x1d   : > { %p752_p3 = por %p121_p0, %p120_p13  ;;  %s381_s6 = sshll.u32 %s715_s22, 7 }
  0x1e   : > { %s380_s7 = sshll.u32 %s758_s5, 3  ;;  %s867_s0 = sld [smem:[#allocation12_spill]] }
  0x1f   : > { %s145_s19 = scalar_lea.vmem [#allocation3], %s380_s7  ;;  %p767_p5 = pnand %p408_p4, %p724_p6 }
  0x20   : > { %s155_s21 = sshll.u32 %s145_s19, 4  ;;  %p384_p7 = scmp.ge.s32.totalorder %s646_s17, 1  ;;  %s156_s21 = int_to_ptr.vmem [resolvable:$true] %s155_s21 }
  0x21   : > { %p181_p9 = scmp.lt.s32.totalorder %s646_s17, 3  ;;  %s142_s26 = scalar_lea.sflag [#allocation4], %s758_s5 }
  0x22   : > { %p484_p10 = pneg %p767_p5  ;;  %s495_s22 = scalar_lea.vmem %s156_s21, 128 }
  0x23   : > { %p496_p11 = scmp.ne.s32.totalorder %s156_s21, %s495_s22  ;;  %s648_s27 = smov [#allocation3]  }
  0x24   : > { %s153_s18 = scalar_lea.hbm %s867_s0, %s381_s6  ;;  %s500_s23 = sshll.u32 %s648_s27, 4  ;;  %s501_s23 = int_to_ptr.vmem [resolvable:$false] %s500_s23 }
  0x25   : > { %p498_p12 = pnand %p496_p11, %p484_p10  ;;  %s502_s28 = scalar_lea.vmem %s501_s23, 256 }
  0x26   : > { %p503_p6 = scmp.lt.s32.totalorder %s156_s21, %s501_s23  ;;  %p504_p0 = scmp.lt.s32.totalorder %s502_s28, %s495_s22 }
  0x27   : > { %p499_p13 = pneg %p498_p12 }
  0x28   : > { %p505_p4 = por %p504_p0, %p503_p6 }
  0x2a   : > { %p506_p2 = pnand %p505_p4, %p499_p13 }
  0x2c   : > { %509 = shalt.err (!%p506_p2)
}
  0x2d   : > { %400 = dma.hbm_to_vmem [thread:$0]  (!%p767_p5), %s153_s18, 128, %s156_s21, %s142_s26  }
  0x2e   : > { %p785_p11 = pnand %p384_p7, %p181_p9  ;;  %s174_s22 = scalar_lea.hbm %s860_s1, %s381_s6 }
  0x2f   : > { %s166_s27 = scalar_lea.vmem [#allocation6], %s380_s7  ;;  %s163_s28 = scalar_lea.sflag [#allocation7], %s758_s5 }
  0x30   : > { %s176_s23 = sshll.u32 %s166_s27, 4  ;;  %s649_s18 = smov [#allocation6]   ;;  %s177_s23 = int_to_ptr.vmem [resolvable:$true] %s176_s23 }
  0x31   : > { %s523_s0 = scalar_lea.vmem %s177_s23, 128  ;;  %s528_s21 = sshll.u32 %s649_s18, 4  ;;  %s529_s21 = int_to_ptr.vmem [resolvable:$false] %s528_s21 }
  0x32   : > { %p524_p2 = scmp.ne.s32.totalorder %s177_s23, %s523_s0  ;;  %s530_s26 = scalar_lea.vmem %s529_s21, 256 }
  0x33   : > { %p531_p7 = scmp.lt.s32.totalorder %s177_s23, %s529_s21  ;;  %p532_p9 = scmp.lt.s32.totalorder %s530_s26, %s523_s0 }
  0x34   : > { %p526_p12 = pnand %p524_p2, %p484_p10 }
  0x35   : > { %p533_p6 = por %p532_p9, %p531_p7 }
  0x36   : > { %p527_p13 = pneg %p526_p12 }
  0x38   : > { %p534_p0 = pnand %p533_p6, %p527_p13 }
  0x3a   : > { %537 = shalt.err (!%p534_p0)
}
  0x3b   : > { %403 = dma.hbm_to_vmem [thread:$0]  (!%p767_p5), %s174_s22, 128, %s177_s23, %s163_s28  }
  0x3c   : > { %185 = sbr.rel (%p785_p11) target bundleno = 107 (0x6b), region = 28  ;;  %s187_s5 = sand.u32 (!%p785_p11), 1, %s630_s13  }
  0x3d   : > { %s385_s6 = sshll.u32 (!%p785_p11), %s187_s5, 3  ;;  %s188_s7 = scalar_lea.sflag (!%p785_p11), [#allocation4], %s187_s5 }
  0x3e   : > { %s191_s12 = scalar_lea.vmem (!%p785_p11), [#allocation3], %s385_s6 }
  0x41   : > { %601 = dma.done.wait (%p729_p8), %s188_s7, 128  }
  0x42   : > { %603 = vsyncadd (%p729_p8), %s188_s7, 4294967168  ;;  %s197_s0 = scalar_lea.sflag [#allocation7], %s187_s5  ;;  %s200_s19 = scalar_lea.vmem [#allocation6], %s385_s6 }
  0x43   : > { %605 = dma.done.wait (%p729_p8), %s197_s0, 128  }
  0x44   : > { %607 = vsyncadd (%p729_p8), %s197_s0, 4294967168  ;;  %s387_s24 = sshll.u32 %s638_s15, 3  ;;  %v238_v0 = vlaneseq  ;;  %v247_v6 = vld [vmem:[%s191_s12] sm:$0xff]  ;;  %v248_v7 = vld [vmem:[%s200_s19] sm:$0xff]  ;;  %s223_s25 = sand.u32 1, %s618_s10  }
  0x45   : > { %v242_v1 = vstv %s387_s24  ;;  %v249_v9 = vsub.f32 %v247_v6, %v248_v7  ;;  %s224_s8 = scalar_lea.vmem [#allocation8], %s223_s25  ;;  %s388_s27 = sshll.u32 %s638_s15, 4 }
  0x46   : > { %v239_v2 = vshrl.u32 %v238_v0, 7  ;;  %v241_v3 = vand.u32 127, %v238_v0  ;;  %s279_s22 = sshll.u32 %s224_s8, 4  ;;  %s277_s18 = scalar_lea.hbm %s861_s2, %s388_s27  ;;  %s280_s22 = int_to_ptr.vmem [resolvable:$true] %s279_s22 }
  0x47   : > { %s267_s21 = scalar_lea.sflag [#allocation5], %s223_s25  ;;  %s538_s26 = scalar_lea.vmem %s280_s22, 16 }
  0x48   : > { %v243_v4 = vadd.s32 %v242_v1, %v239_v2  ;;  %p539_p8 = scmp.ne.s32.totalorder %s280_s22, %s538_s26  ;;  %s650_s5 = smov [#allocation8]  }
  0x49   : > { %s542_s6 = sshll.u32 %s650_s5, 4  ;;  %s543_s6 = int_to_ptr.vmem [resolvable:$false] %s542_s6 }
  0x4a   : > { %v244_v5 = vmul.u32 128, %v243_v4  ;;  %p540_p5 = pnand %p539_p8, %p747_p1  ;;  %s544_s7 = scalar_lea.vmem %s543_s6, 32 }
  0x4b   : > { %p545_p4 = scmp.lt.s32.totalorder %s280_s22, %s543_s6  ;;  %p546_p11 = scmp.lt.s32.totalorder %s544_s7, %s538_s26 }
  0x4c   : > { %v245_v8 = vadd.s32 %v244_v5, %v241_v3  ;;  %p541_p10 = pneg %p540_p5 }
  0x4d   : > { %p547_p2 = por %p546_p11, %p545_p4 }
  0x4e   : > { %vm246_vm0 = vcmp.lt.s32.totalorder %v245_v8, 2048 }
  0x4f   : > { %v250_v10 = vsel %vm246_vm0, %v249_v9, 0.0  ;;  %p548_p12 = pnand %p547_p2, %p541_p10 }
  0x50   : > { %v252_v11 = vmul.f32 %v250_v10, %v250_v10 }
  0x52   : > { %v259_v12 = vrot.slane %v252_v11, 4 }
  0x54   : > { %v260_v13 = vadd.f32 %v259_v12, %v252_v11 }
  0x56   : > { %v261_v14 = vrot.slane %v260_v13, 2 }
  0x58   : > { %v262_v15 = vadd.f32 %v261_v14, %v260_v13 }
  0x5a   : > { %v263_v16 = vrot.slane %v262_v15, 1 }
  0x5c   : > { %v264_v17 = vadd.f32 %v263_v16, %v262_v15 }
  0x5e   : > { %265 = vst [vmem:[%s224_s8] sm:$0x1] %v264_v17 }
  0x5f   : > { %551 = shalt.err (!%p548_p12)
}
  0x60   : > { %s552_s15 = scalar_lea.hbm %s277_s18, 16  ;;  %s556_s19 = scalar_lea.hbm %s861_s2, 32 }
  0x61   : > { %p553_p13 = scmp.ne.s32.totalorder %s277_s18, %s552_s15  ;;  %p557_p6 = scmp.lt.s32.totalorder %s277_s18, %s861_s2 }
  0x62   : > { %p558_p0 = scmp.lt.s32.totalorder %s556_s19, %s552_s15 }
  0x63   : > { %p554_p7 = pnand %p553_p13, %p747_p1 }
  0x64   : > { %p559_p8 = por %p558_p0, %p557_p6 }
  0x65   : > { %p555_p9 = pneg %p554_p7 }
  0x67   : > { %p560_p5 = pnand %p559_p8, %p555_p9 }
  0x69   : > { %563 = shalt.err (!%p560_p5)
}
  0x6a   : > { %395 = dma.vmem_to_hbm [thread:$0]  (%p747_p1), %s280_s22, 16, %s277_s18, %s267_s21  }
  0x6b PF: > { %s291_s8 = sand.u32 1, %s614_s9   ;;  %p870_p10 = scmp.ge.s32.totalorder %s646_s17, 2 }
  0x6c   : > { %s292_s27 = scalar_lea.sflag [#allocation5], %s291_s8 }
  0x6d   : > { %p405_p4 = pnand %p870_p10, %p752_p3 }
  0x6f   : > { %p406_p11 = pneg %p405_p4 }
  0x71   : > { %609 = dma.done.wait (%p406_p11), %s292_s27, 16  }
  0x72   : > { %611 = vsyncadd (%p406_p11), %s292_s27, 4294967280  ;;  %s21_s17 = sadd.s32 1, %s646_s17   ;;  %s871_s9 = smov %s618_s10 }
  0x73   : > { %p18_p2 = scmp.ge.s32.totalorder %s21_s17, 4   ;;  %s872_s10 = smov %s622_s11 }
  0x74   : > { %s873_s11 = smov %s738_s29  ;;  %s874_s12 = smov %s630_s13 }
  0x75   : > { %s875_s13 = smov %s634_s14  ;;  %s876_s14 = smov %s741_s30 }
  0x76   : > { %s877_s15 = smov %s642_s16  ;;  %s878_s16 = smov %s880_s20 }
  0x77   :  { %20 = sbr.rel (!%p18_p2) target bundleno = 12 (0xc), region = 94 }
  0x7c   :  { %296 = vsyncpa [#allocation4], 1 }
  0x7d   :  { %298 = vsyncpa [#allocation4 + $0x1], 1 }
  0x7e   :  { %299 = vsyncpa [#allocation7], 1 }
  0x7f   :  { %301 = vsyncpa [#allocation7 + $0x1], 1 }
  0x80   :  { %302 = vsyncpa [#allocation5], 1 }
  0x81   :  { %304 = vsyncpa [#allocation5 + $0x1], 1 }

</bundles_post_ra>
